<compile_context>
chip_gen: v7x
topology: tpu7x:2x2x1
jax: 0.10.0
libtpu: 0.0.40
codegen_flags: <defaults>
</compile_context>

<pallas_src>
import functools

import jax
import jax.numpy as jnp
import numpy as np
from jax.experimental import pallas as pl
from jax.experimental.pallas import tpu as pltpu

_LANE = 128                      # lane width
_SUBLANE = 16                    # bf16 sublane packing (also a multiple of 8 for f32)
_VMEM_WORKING_BUDGET = 40 << 20  # working budget for tile selection
_VMEM_LIMIT_CAP = 48 << 20       # never ask for more than this (v7x has 64 MiB total)


def _round_up(x, m):
    return ((x + m - 1) // m) * m


def _tile_vmem_bytes(tb, tn, kp, in_itemsize, w_bufs):
    """Approximate VMEM footprint of one pipelined step."""
    return (2 * tb * kp * in_itemsize        # x tile, double-buffered
            + w_bufs * kp * tn * in_itemsize  # W_eff tile
            + w_bufs * tn * 4                 # b_eff tile (f32)
            + 2 * tb * tn * 4)                # out tile (f32), double-buffered


def _choose_tiles(B, Kp, Np, block_b, block_n, in_itemsize):
    tn = min(_round_up(block_n, _LANE), Np)
    tb = min(_round_up(block_b, _SUBLANE), _round_up(B, _SUBLANE))
    # Keep the parallel grid >= 2 steps when possible so v7x's two TensorCores
    # both get work.
    if Np // tn == 1 and B > _SUBLANE and pl.cdiv(B, tb) < 2:
        tb = _round_up(pl.cdiv(B, 2), _SUBLANE)
    # Shrink tiles until the (conservative, fully double-buffered) footprint fits.
    while _tile_vmem_bytes(tb, tn, Kp, in_itemsize, 2) > _VMEM_WORKING_BUDGET and tb > _SUBLANE:
        tb = max(_SUBLANE, _round_up(tb // 2, _SUBLANE))
    while _tile_vmem_bytes(tb, tn, Kp, in_itemsize, 2) > _VMEM_WORKING_BUDGET and tn > _LANE:
        tn = max(_LANE, _round_up(tn // 2, _LANE))
    return tb, tn


# --------------------------------- Pallas kernel -------------------------------

def swish_linear_kernel(x_ref, w_ref, b_ref, o_ref):
    # x_ref: (tb, Kp) bf16   w_ref: (Kp, tn) bf16   b_ref: (1, tn) f32   o_ref: (tb, tn)
    z = jnp.dot(x_ref[...], w_ref[...], preferred_element_type=jnp.float32)
    z = z + b_ref[...]                                   # folded Linear bias + BN shift
    hs = jnp.clip(z + 3.0, 0.0, 6.0) * (1.0 / 6.0)       # h_sigmoid, f32 epilogue (v5e-safe)
    o_ref[...] = (z * hs).astype(o_ref.dtype)            # h_swish, cast only at the store


# ----------------------------- parameter folding (hoisted) ---------------------

def fold_swish_linear_params(weight, bias, gamma, beta, running_mean, running_var,
                             *, eps=1e-5, compute_dtype=jnp.bfloat16):
    """Fold eval-mode BatchNorm1d + Linear bias into padded matmul operands.

    weight: (oup, inp) torch layout. Returns W_eff (Kp, Np) in `compute_dtype`
    and b_eff (1, Np) in f32, with Kp = roundup(inp, 16), Np = roundup(oup, 128).
    Call once per set of weights (hoisted off the per-call path).
    """
    oup, inp = weight.shape
    scale = gamma * jax.lax.rsqrt(running_var + eps)             # (oup,)
    shift = beta - running_mean * scale                          # (oup,)
    w_eff = weight.T * scale[None, :]                            # (inp, oup) f32
    b_eff = (bias * scale + shift)[None, :]                      # (1, oup)  f32
    k_pad = _round_up(inp, _SUBLANE)
    n_pad = _round_up(oup, _LANE)
    w_eff = jnp.pad(w_eff, ((0, k_pad - inp), (0, n_pad - oup))).astype(compute_dtype)
    b_eff = jnp.pad(b_eff, ((0, 0), (0, n_pad - oup))).astype(jnp.float32)
    return w_eff, b_eff


# ----------------------------------- forward -----------------------------------

@functools.partial(jax.jit,
                   static_argnames=("oup", "tb", "tn", "single_buffer_resident"))
def _swish_linear_fwd_impl(x, w_eff, b_eff, *, oup, tb, tn, single_buffer_resident):
    B, inp = x.shape
    Kp, Np = w_eff.shape
    in_itemsize = jnp.dtype(w_eff.dtype).itemsize

    # Pad batch to a tile multiple, pad K, cast the matmul operand to bf16.
    Bp = _round_up(B, tb)
    xp = jnp.pad(x, ((0, Bp - B), (0, Kp - inp))).astype(w_eff.dtype)

    grid = (Bp // tb, Np // tn)

    resident_kwargs = {}
    if single_buffer_resident:
        # Weight/bias block index never changes -> no need to double-buffer them.
        resident_kwargs = dict(pipeline_mode=pl.Buffered(1))

    in_specs = [
        pl.BlockSpec((tb, Kp), lambda i, j: (i, 0)),                      # x tile
        pl.BlockSpec((Kp, tn), lambda i, j: (0, j), **resident_kwargs),   # W_eff tile
        pl.BlockSpec((1, tn), lambda i, j: (0, j), **resident_kwargs),    # b_eff tile
    ]
    out_spec = pl.BlockSpec((tb, tn), lambda i, j: (i, j))

    w_bufs = 1 if single_buffer_resident else 2
    tile_bytes = _tile_vmem_bytes(tb, tn, Kp, in_itemsize, w_bufs)
    vmem_limit = int(min(_VMEM_LIMIT_CAP, tile_bytes + (4 << 20)))

    cost = pl.CostEstimate(
        flops=2 * Bp * Kp * Np + 6 * Bp * Np,
        transcendentals=0,
        bytes_accessed=(Bp * Kp + Kp * Np) * in_itemsize + Np * 4 + Bp * Np * x.dtype.itemsize,
    )

    out = pl.pallas_call(
        swish_linear_kernel,
        out_shape=jax.ShapeDtypeStruct((Bp, Np), x.dtype),
        grid_spec=pltpu.PrefetchScalarGridSpec(
            num_scalar_prefetch=0,
            grid=grid,
            in_specs=in_specs,
            out_specs=out_spec,
        ),
        compiler_params=pltpu.CompilerParams(
            dimension_semantics=("parallel", "parallel"),
            vmem_limit_bytes=vmem_limit,
        ),
        cost_estimate=cost,
    )(xp, w_eff, b_eff)

    return out[:B, :oup]


def swish_linear_fwd(x, w_eff, b_eff, *, oup, block_b=256, block_n=512):
    """x: (B, inp) f32; w_eff/b_eff from fold_swish_linear_params. Returns (B, oup)."""
    B, _ = x.shape
    Kp, Np = w_eff.shape
    tb, tn = _choose_tiles(B, Kp, Np, block_b, block_n, jnp.dtype(w_eff.dtype).itemsize)

    want_single_buffer = (Np // tn == 1) and hasattr(pl, "Buffered")
    if want_single_buffer:
        try:
            return _swish_linear_fwd_impl(x, w_eff, b_eff, oup=oup, tb=tb, tn=tn,
                                          single_buffer_resident=True)
        except Exception:
            # pipeline_mode not supported on this jax/libtpu -> plain double buffering.
            pass
    return _swish_linear_fwd_impl(x, w_eff, b_eff, oup=oup, tb=tb, tn=tn,
                                  single_buffer_resident=False)


def swish_linear_pallas(x, weight, bias, gamma, beta, running_mean, running_var,
                        *, eps=1e-5, block_b=256, block_n=512):
    """Convenience wrapper taking raw torch-layout parameters."""
    w_eff, b_eff = fold_swish_linear_params(weight, bias, gamma, beta,
                                            running_mean, running_var, eps=eps)
    return swish_linear_fwd(x, w_eff, b_eff, oup=weight.shape[0],
                            block_b=block_b, block_n=block_n)


# ------------------------------ pure-JAX reference -----------------------------

def swish_linear_ref(x, weight, bias, gamma, beta, running_mean, running_var, *, eps=1e-5):
    y = x @ weight.T + bias
    y = gamma * (y - running_mean) / jnp.sqrt(running_var + eps) + beta
    return y * (jnp.clip(y + 3.0, 0.0, 6.0) / 6.0)


# ------------------------------------ main --------------------------------------

if __name__ == "__main__":
    # Deliberately non-aligned small shapes to exercise the batch/K/N padding paths.
    B, inp, oup = 48, 24, 80

    key = jax.random.PRNGKey(0)
    kx, kw, kb, kg, kbe, km, kv = jax.random.split(key, 7)
    x = jax.random.normal(kx, (B, inp), dtype=jnp.float32)
    weight = jax.random.normal(kw, (oup, inp), dtype=jnp.float32) * 0.2   # torch (out, in)
    bias = jax.random.normal(kb, (oup,), dtype=jnp.float32) * 0.1
    gamma = 1.0 + 0.1 * jax.random.normal(kg, (oup,), dtype=jnp.float32)
    beta = 0.1 * jax.random.normal(kbe, (oup,), dtype=jnp.float32)
    running_mean = 0.1 * jax.random.normal(km, (oup,), dtype=jnp.float32)
    running_var = jnp.abs(jax.random.normal(kv, (oup,), dtype=jnp.float32)) + 0.5

    # Fold the BN / bias into the matmul operands once (hoisted off the hot path) ...
    w_eff, b_eff = fold_swish_linear_params(weight, bias, gamma, beta,
                                            running_mean, running_var)
    w_eff, b_eff = jax.block_until_ready((w_eff, b_eff))

    # ... then run the fused kernel.
    out = swish_linear_fwd(x, w_eff, b_eff, oup=oup)
    out = jax.block_until_ready(out)

    ref = swish_linear_ref(x, weight, bias, gamma, beta, running_mean, running_var)
    ref = jax.block_until_ready(ref)

    assert out.shape == (B, oup)
    # bf16 matmul operands (f32 accumulation/epilogue) -> bf16-level tolerances.
    np.testing.assert_allclose(np.asarray(out), np.asarray(ref), rtol=2e-2, atol=2e-2)
    print("KERNEL_OK")
</pallas_src>

<mosaic_0001>
module attributes {stable_mosaic.version = 11 : i64} {
  func.func @swish_linear_kernel(%arg0: i32, %arg1: i32, %arg2: memref<32x32xbf16, #tpu.memory_space<vmem>>, %arg3: memref<32x128xbf16, #tpu.memory_space<vmem>>, %arg4: memref<1x128xf32, #tpu.memory_space<vmem>>, %arg5: memref<32x128xf32, #tpu.memory_space<vmem>>) attributes {dimension_semantics = [#tpu.dimension_semantics<parallel>, #tpu.dimension_semantics<parallel>], iteration_bounds = array<i64: 2, 1>, scalar_prefetch = 0 : i64, scratch_operands = 0 : i64, tpu.core_type = #tpu.core_type<tc>, window_params = [{transform_indices = @transform_0, window_bounds = array<i64: 32, 32>}, {pipeline_mode = #tpu.pipeline_mode<synchronous>, transform_indices = @transform_1, window_bounds = array<i64: 32, 128>}, {pipeline_mode = #tpu.pipeline_mode<synchronous>, transform_indices = @transform_2, window_bounds = array<i64: 1, 128>}, {transform_indices = @transform_3, window_bounds = array<i64: 32, 128>}]} {
    %c0 = arith.constant 0 : index
    %c0_0 = arith.constant 0 : index
    %0 = vector.load %arg2[%c0, %c0_0] : memref<32x32xbf16, #tpu.memory_space<vmem>>, vector<32x32xbf16>
    %c0_1 = arith.constant 0 : index
    %c0_2 = arith.constant 0 : index
    %1 = vector.load %arg3[%c0_1, %c0_2] : memref<32x128xbf16, #tpu.memory_space<vmem>>, vector<32x128xbf16>
    %cst = arith.constant dense<0.000000e+00> : vector<32x128xf32>
    %2 = tpu.matmul %0, %1, %cst {dimension_numbers = #tpu.dot_dimension_numbers<[1], [0], [0], [1], [0, 0, 1, 1], [], []>} : vector<32x32xbf16>, vector<32x128xbf16>, vector<32x128xf32> -> vector<32x128xf32>
    %c0_3 = arith.constant 0 : index
    %c0_4 = arith.constant 0 : index
    %3 = vector.load %arg4[%c0_3, %c0_4] : memref<1x128xf32, #tpu.memory_space<vmem>>, vector<1x128xf32>
    %4 = vector.broadcast %3 : vector<1x128xf32> to vector<32x128xf32>
    %5 = arith.addf %2, %4 : vector<32x128xf32>
    %cst_5 = arith.constant 3.000000e+00 : f32
    %6 = vector.broadcast %cst_5 : f32 to vector<32x128xf32>
    %7 = arith.addf %5, %6 : vector<32x128xf32>
    %cst_6 = arith.constant 0.000000e+00 : f32
    %cst_7 = arith.constant 6.000000e+00 : f32
    %8 = vector.broadcast %cst_6 : f32 to vector<32x128xf32>
    %9 = arith.maximumf %8, %7 : vector<32x128xf32>
    %10 = vector.broadcast %cst_7 : f32 to vector<32x128xf32>
    %11 = arith.minimumf %10, %9 : vector<32x128xf32>
    %cst_8 = arith.constant 0.166666672 : f32
    %12 = vector.broadcast %cst_8 : f32 to vector<32x128xf32>
    %13 = arith.mulf %11, %12 : vector<32x128xf32>
    %14 = arith.mulf %5, %13 : vector<32x128xf32>
    %c0_9 = arith.constant 0 : index
    %c0_10 = arith.constant 0 : index
    %15 = vector.load %arg5[%c0_9, %c0_10] : memref<32x128xf32, #tpu.memory_space<vmem>>, vector<32x128xf32>
    tpu.vector_store %arg5[%c0_9, %c0_10], %14 {strides = array<i32>} : memref<32x128xf32, #tpu.memory_space<vmem>>, vector<32x128xf32>,
    return
  }
  func.func @transform_0(%arg0: i32, %arg1: i32) -> (i32, i32) {
    %c0_i32 = arith.constant 0 : i32
    %c0_i32_0 = arith.constant 0 : i32
    return %arg0, %c0_i32 : i32, i32
  }
  func.func @transform_1(%arg0: i32, %arg1: i32) -> (i32, i32) {
    %c0_i32 = arith.constant 0 : i32
    %c0_i32_0 = arith.constant 0 : i32
    return %c0_i32, %arg1 : i32, i32
  }
  func.func @transform_2(%arg0: i32, %arg1: i32) -> (i32, i32) {
    %c0_i32 = arith.constant 0 : i32
    %c0_i32_0 = arith.constant 0 : i32
    return %c0_i32, %arg1 : i32, i32
  }
  func.func @transform_3(%arg0: i32, %arg1: i32) -> (i32, i32) {
    %c0_i32 = arith.constant 0 : i32
    return %arg0, %arg1 : i32, i32
  }
}

module attributes {stable_mosaic.version = 11 : i64} {
  func.func @swish_linear_kernel(%arg0: i32, %arg1: i32, %arg2: memref<32x32xbf16, #tpu.memory_space<vmem>>, %arg3: memref<32x128xbf16, #tpu.memory_space<vmem>>, %arg4: memref<1x128xf32, #tpu.memory_space<vmem>>, %arg5: memref<32x128xf32, #tpu.memory_space<vmem>>) attributes {dimension_semantics = [#tpu.dimension_semantics<parallel>, #tpu.dimension_semantics<parallel>], iteration_bounds = array<i64: 2, 1>, scalar_prefetch = 0 : i64, scratch_operands = 0 : i64, tpu.core_type = #tpu.core_type<tc>, window_params = [{transform_indices = @transform_0, window_bounds = array<i64: 32, 32>}, {transform_indices = @transform_1, window_bounds = array<i64: 32, 128>}, {transform_indices = @transform_2, window_bounds = array<i64: 1, 128>}, {transform_indices = @transform_3, window_bounds = array<i64: 32, 128>}]} {
    %c0 = arith.constant 0 : index
    %c0_0 = arith.constant 0 : index
    %0 = vector.load %arg2[%c0, %c0_0] : memref<32x32xbf16, #tpu.memory_space<vmem>>, vector<32x32xbf16>
    %c0_1 = arith.constant 0 : index
    %c0_2 = arith.constant 0 : index
    %1 = vector.load %arg3[%c0_1, %c0_2] : memref<32x128xbf16, #tpu.memory_space<vmem>>, vector<32x128xbf16>
    %cst = arith.constant dense<0.000000e+00> : vector<32x128xf32>
    %2 = tpu.matmul %0, %1, %cst {dimension_numbers = #tpu.dot_dimension_numbers<[1], [0], [0], [1], [0, 0, 1, 1], [], []>} : vector<32x32xbf16>, vector<32x128xbf16>, vector<32x128xf32> -> vector<32x128xf32>
    %c0_3 = arith.constant 0 : index
    %c0_4 = arith.constant 0 : index
    %3 = vector.load %arg4[%c0_3, %c0_4] : memref<1x128xf32, #tpu.memory_space<vmem>>, vector<1x128xf32>
    %4 = vector.broadcast %3 : vector<1x128xf32> to vector<32x128xf32>
    %5 = arith.addf %2, %4 : vector<32x128xf32>
    %cst_5 = arith.constant 3.000000e+00 : f32
    %6 = vector.broadcast %cst_5 : f32 to vector<32x128xf32>
    %7 = arith.addf %5, %6 : vector<32x128xf32>
    %cst_6 = arith.constant 0.000000e+00 : f32
    %cst_7 = arith.constant 6.000000e+00 : f32
    %8 = vector.broadcast %cst_6 : f32 to vector<32x128xf32>
    %9 = arith.maximumf %8, %7 : vector<32x128xf32>
    %10 = vector.broadcast %cst_7 : f32 to vector<32x128xf32>
    %11 = arith.minimumf %10, %9 : vector<32x128xf32>
    %cst_8 = arith.constant 0.166666672 : f32
    %12 = vector.broadcast %cst_8 : f32 to vector<32x128xf32>
    %13 = arith.mulf %11, %12 : vector<32x128xf32>
    %14 = arith.mulf %5, %13 : vector<32x128xf32>
    %c0_9 = arith.constant 0 : index
    %c0_10 = arith.constant 0 : index
    %15 = vector.load %arg5[%c0_9, %c0_10] : memref<32x128xf32, #tpu.memory_space<vmem>>, vector<32x128xf32>
    tpu.vector_store %arg5[%c0_9, %c0_10], %14 {strides = array<i32>} : memref<32x128xf32, #tpu.memory_space<vmem>>, vector<32x128xf32>,
    return
  }
  func.func @transform_0(%arg0: i32, %arg1: i32) -> (i32, i32) {
    %c0_i32 = arith.constant 0 : i32
    %c0_i32_0 = arith.constant 0 : i32
    return %arg0, %c0_i32 : i32, i32
  }
  func.func @transform_1(%arg0: i32, %arg1: i32) -> (i32, i32) {
    %c0_i32 = arith.constant 0 : i32
    %c0_i32_0 = arith.constant 0 : i32
    return %c0_i32, %arg1 : i32, i32
  }
  func.func @transform_2(%arg0: i32, %arg1: i32) -> (i32, i32) {
    %c0_i32 = arith.constant 0 : i32
    %c0_i32_0 = arith.constant 0 : i32
    return %c0_i32, %arg1 : i32, i32
  }
  func.func @transform_3(%arg0: i32, %arg1: i32) -> (i32, i32) {
    %c0_i32 = arith.constant 0 : i32
    return %arg0, %arg1 : i32, i32
  }
}

</mosaic_0001>

<bundles_post_ra>
// kernel: _swish_linear_fwd_impl.1
= control target key start
LH: loop header
LB: loop body
LE: loop exit
PB: predicated region body
PF: predicated region fallthrough
CT: control target
= control target key end

     0   :  { %s549_s12 = smov 0   ;;  %s551_s13 = smov 0   ;;  %s595_s0 = inlined_call_operand.vmem [shape: bf16[64,32], index: 0, kind: input, shape index: {}]   ;;  %s596_s1 = inlined_call_operand.vmem [shape: bf16[32,128], index: 1, kind: input, shape index: {}]   ;;  %s597_s2 = inlined_call_operand.vmem [shape: f32[1,128], index: 2, kind: input, shape index: {}]   ;;  %s598_s3 = inlined_call_operand.vmem [shape: f32[64,128], index: 3, kind: output, shape index: {}]  }
   0x1   :  { %s553_s14 = smov 0  }
   0x2 LB: > { %s25_s15 = sadd.s32 1, %s523_s13  ;;  %p451_p0 = scmp.ge.s32.totalorder %s527_s14, 1  ;;  %s527_s14 = sphi %s553_s14, %s13_s14   ;;  %s523_s13 = sphi %s551_s13, %s600_s13   ;;  %s519_s12 = sphi %s549_s12, %s599_s12  }
   0x3   : > { %p27_p1 = scmp.ge.s32.totalorder %s25_s15, 2  ;;  %p169_p2 = scmp.lt.s32.totalorder %s527_s14, 3 }
   0x5   : > { %s602_s15 = smov (%p27_p1, %s25_s15), 0  ;;  %p170_p3 = pnand %p451_p0, %p169_p2 }
   0x6   : > { %v501_v0 = vld [vmem:[%s596_s1] sm:$0xff] (!%p170_p3)   ;;  %s452_s18 = sshll.u32 (!%p170_p3), %s519_s12, 2  ;;  %v502_v1 = vld [vmem:[%s596_s1 + $0x8] sm:$0xff] (!%p170_p3)   ;;  %vm263_vm0 = vcmask (!%p170_p3), 261120  }
   0x7   : > { %173 = sbr.rel (%p170_p3) target bundleno = 247 (0xf7), region = 32  ;;  %p204_p4 = scmp.lt.s32.totalorder (!%p170_p3), %s452_s18, 7  ;;  %469 = vmatprep.subr.bf16.mxu0 (!%p170_p3), %v501_v0  ;;  %v456_v4 = vld [vmem:[%s597_s2] ss:$0 sm:$0xff] (!%p170_p3) }
   0x8   : > { %470 = vmatpush3.bf16.msra.mxu0 (!%p170_p3), %v501_v0 }
   0x9   : > { %471 = vmatprep.subr.bf16.mxu0 (!%p170_p3), %v502_v1 }
   0xc   : > { %472 = vmatpush3.bf16.msra.mxu0 (!%p170_p3), %v502_v1 }
   0xe   : > { %s604_s18 = smov (!%p204_p4, %s452_s18), 7 }
   0xf   : > { %s453_s21 = sshll.u32 %s604_s18, 2  ;;  %s455_s27 = sshll.u32 %s604_s18, 3 }
  0x10   : > { %s207_s24 = scalar_lea.vmem %s595_s0, %s453_s21  ;;  %s223_s30 = scalar_lea.vmem %s598_s3, %s455_s27 }
  0x11   : > { %v503_v2 = vld [vmem:[%s207_s24] sm:$0xff]   ;;  %v504_v3 = vld [vmem:[%s207_s24 + $0x8] sm:$0xff]  }
  0x12   : > { %473 = vmatprep.mubr.msk.bf16.mxu0 %vm263_vm0, %v503_v2 }
  0x13   : > { %474 = vmatmul.mubr.msk.bf16.vlgmr.msra.gmra.mrb[0].mxu0 %vm263_vm0, %v504_v3 }
  0xe6   : > { %v475_v5 = vpop.f32.mrb[0].mxu0 }
  0xe7   : > { %v313_v6 = vadd.f32 %v475_v5, %v456_v4  ;;  %v304_v7 = vpop.f32.mrb[1].mxu0 }
  0xe8   : > { %v305_v8 = vadd.f32 %v456_v4, %v304_v7  ;;  %v476_v9 = vpop.f32.mrb[2].mxu0 }
  0xe9   : > { %v321_v10 = vadd.f32 3.0, %v313_v6  ;;  %v316_v11 = vadd.f32 %v476_v9, %v456_v4  ;;  %v307_v12 = vpop.f32.mrb[3].mxu0 }
  0xea   : > { %v319_v13 = vadd.f32 3.0, %v305_v8  ;;  %v308_v14 = vadd.f32 %v456_v4, %v307_v12 }
  0xeb   : > { %v325_v15 = vmax.f32 %v321_v10, 0.0  ;;  %v322_v16 = vadd.f32 3.0, %v316_v11 }
  0xec   : > { %v323_v17 = vmax.f32 %v319_v13, 0.0  ;;  %v320_v18 = vadd.f32 3.0, %v308_v14 }
  0xed   : > { %v329_v19 = vmin.f32 %v325_v15, 6.0  ;;  %v326_v20 = vmax.f32 %v322_v16, 0.0 }
  0xee   : > { %v327_v21 = vmin.f32 %v323_v17, 6.0  ;;  %v324_v22 = vmax.f32 %v320_v18, 0.0 }
  0xef   : > { %v330_v23 = vmin.f32 %v326_v20, 6.0  ;;  %v333_v26 = vmul.f32 0.16666667, %v329_v19 }
  0xf0   : > { %v331_v24 = vmul.f32 0.16666667, %v327_v21  ;;  %v328_v25 = vmin.f32 %v324_v22, 6.0 }
  0xf1   : > { %v334_v28 = vmul.f32 0.16666667, %v330_v23  ;;  %v337_v31 = vmul.f32 %v333_v26, %v313_v6 }
  0xf2   : > { %v335_v27 = vmul.f32 %v331_v24, %v305_v8  ;;  %v332_v29 = vmul.f32 0.16666667, %v328_v25 }
  0xf3   : > { %v338_v32 = vmul.f32 %v334_v28, %v316_v11  ;;  %341 = vst [vmem:[%s223_s30 + $0x10] sm:$0xff] %v337_v31 }
  0xf4   : > { %339 = vst [vmem:[%s223_s30] sm:$0xff] %v335_v27  ;;  %v336_v30 = vmul.f32 %v332_v29, %v308_v14 }
  0xf5   : > { %342 = vst [vmem:[%s223_s30 + $0x18] sm:$0xff] %v338_v32 }
  0xf6   : > { %340 = vst [vmem:[%s223_s30 + $0x8] sm:$0xff] %v336_v30 }
  0xf7 PF: > { %s13_s14 = sadd.s32 1, %s527_s14   ;;  %s599_s12 = smov %s523_s13 }
  0xf8   : > { %p10_p5 = scmp.ge.s32.totalorder %s13_s14, 4   ;;  %s600_s13 = smov %s602_s15 }
  0xfa   :  { %12 = sbr.rel (!%p10_p5) target bundleno = 2 (0x2), region = 68 }

// kernel: _swish_linear_fwd_impl.1
= control target key start
LH: loop header
LB: loop body
LE: loop exit
PB: predicated region body
PF: predicated region fallthrough
CT: control target
= control target key end

     0   :  { %s549_s12 = smov 0   ;;  %s551_s13 = smov 0   ;;  %s595_s0 = inlined_call_operand.vmem [shape: bf16[64,32], index: 0, kind: input, shape index: {}]   ;;  %s596_s1 = inlined_call_operand.vmem [shape: bf16[32,128], index: 1, kind: input, shape index: {}]   ;;  %s597_s2 = inlined_call_operand.vmem [shape: f32[1,128], index: 2, kind: input, shape index: {}]   ;;  %s598_s3 = inlined_call_operand.vmem [shape: f32[64,128], index: 3, kind: output, shape index: {}]  }
   0x1   :  { %s553_s14 = smov 0  }
   0x2 LB: > { %s25_s15 = sadd.s32 1, %s523_s13  ;;  %p451_p0 = scmp.ge.s32.totalorder %s527_s14, 1  ;;  %s527_s14 = sphi %s553_s14, %s13_s14   ;;  %s523_s13 = sphi %s551_s13, %s600_s13   ;;  %s519_s12 = sphi %s549_s12, %s599_s12  }
   0x3   : > { %p27_p1 = scmp.ge.s32.totalorder %s25_s15, 2  ;;  %p169_p2 = scmp.lt.s32.totalorder %s527_s14, 3 }
   0x5   : > { %s602_s15 = smov (%p27_p1, %s25_s15), 0  ;;  %p170_p3 = pnand %p451_p0, %p169_p2 }
   0x6   : > { %v501_v0 = vld [vmem:[%s596_s1] sm:$0xff] (!%p170_p3)   ;;  %s452_s18 = sshll.u32 (!%p170_p3), %s519_s12, 2  ;;  %v502_v1 = vld [vmem:[%s596_s1 + $0x8] sm:$0xff] (!%p170_p3)   ;;  %vm263_vm0 = vcmask (!%p170_p3), 261120  }
   0x7   : > { %173 = sbr.rel (%p170_p3) target bundleno = 247 (0xf7), region = 32  ;;  %p204_p4 = scmp.lt.s32.totalorder (!%p170_p3), %s452_s18, 7  ;;  %469 = vmatprep.subr.bf16.mxu0 (!%p170_p3), %v501_v0  ;;  %v456_v4 = vld [vmem:[%s597_s2] ss:$0 sm:$0xff] (!%p170_p3) }
   0x8   : > { %470 = vmatpush3.bf16.msra.mxu0 (!%p170_p3), %v501_v0 }
   0x9   : > { %471 = vmatprep.subr.bf16.mxu0 (!%p170_p3), %v502_v1 }
   0xc   : > { %472 = vmatpush3.bf16.msra.mxu0 (!%p170_p3), %v502_v1 }
   0xe   : > { %s604_s18 = smov (!%p204_p4, %s452_s18), 7 }
   0xf   : > { %s453_s21 = sshll.u32 %s604_s18, 2  ;;  %s455_s27 = sshll.u32 %s604_s18, 3 }
  0x10   : > { %s207_s24 = scalar_lea.vmem %s595_s0, %s453_s21  ;;  %s223_s30 = scalar_lea.vmem %s598_s3, %s455_s27 }
  0x11   : > { %v503_v2 = vld [vmem:[%s207_s24] sm:$0xff]   ;;  %v504_v3 = vld [vmem:[%s207_s24 + $0x8] sm:$0xff]  }
  0x12   : > { %473 = vmatprep.mubr.msk.bf16.mxu0 %vm263_vm0, %v503_v2 }
  0x13   : > { %474 = vmatmul.mubr.msk.bf16.vlgmr.msra.gmra.mrb[0].mxu0 %vm263_vm0, %v504_v3 }
  0xe6   : > { %v475_v5 = vpop.f32.mrb[0].mxu0 }
  0xe7   : > { %v313_v6 = vadd.f32 %v475_v5, %v456_v4  ;;  %v304_v7 = vpop.f32.mrb[1].mxu0 }
  0xe8   : > { %v305_v8 = vadd.f32 %v456_v4, %v304_v7  ;;  %v476_v9 = vpop.f32.mrb[2].mxu0 }
  0xe9   : > { %v321_v10 = vadd.f32 3.0, %v313_v6  ;;  %v316_v11 = vadd.f32 %v476_v9, %v456_v4  ;;  %v307_v12 = vpop.f32.mrb[3].mxu0 }
  0xea   : > { %v319_v13 = vadd.f32 3.0, %v305_v8  ;;  %v308_v14 = vadd.f32 %v456_v4, %v307_v12 }
  0xeb   : > { %v325_v15 = vmax.f32 %v321_v10, 0.0  ;;  %v322_v16 = vadd.f32 3.0, %v316_v11 }
  0xec   : > { %v323_v17 = vmax.f32 %v319_v13, 0.0  ;;  %v320_v18 = vadd.f32 3.0, %v308_v14 }
  0xed   : > { %v329_v19 = vmin.f32 %v325_v15, 6.0  ;;  %v326_v20 = vmax.f32 %v322_v16, 0.0 }
  0xee   : > { %v327_v21 = vmin.f32 %v323_v17, 6.0  ;;  %v324_v22 = vmax.f32 %v320_v18, 0.0 }
  0xef   : > { %v330_v23 = vmin.f32 %v326_v20, 6.0  ;;  %v333_v26 = vmul.f32 0.16666667, %v329_v19 }
  0xf0   : > { %v331_v24 = vmul.f32 0.16666667, %v327_v21  ;;  %v328_v25 = vmin.f32 %v324_v22, 6.0 }
  0xf1   : > { %v334_v28 = vmul.f32 0.16666667, %v330_v23  ;;  %v337_v31 = vmul.f32 %v333_v26, %v313_v6 }
  0xf2   : > { %v335_v27 = vmul.f32 %v331_v24, %v305_v8  ;;  %v332_v29 = vmul.f32 0.16666667, %v328_v25 }
  0xf3   : > { %v338_v32 = vmul.f32 %v334_v28, %v316_v11  ;;  %341 = vst [vmem:[%s223_s30 + $0x10] sm:$0xff] %v337_v31 }
  0xf4   : > { %339 = vst [vmem:[%s223_s30] sm:$0xff] %v335_v27  ;;  %v336_v30 = vmul.f32 %v332_v29, %v308_v14 }
  0xf5   : > { %342 = vst [vmem:[%s223_s30 + $0x18] sm:$0xff] %v338_v32 }
  0xf6   : > { %340 = vst [vmem:[%s223_s30 + $0x8] sm:$0xff] %v336_v30 }
  0xf7 PF: > { %s13_s14 = sadd.s32 1, %s527_s14   ;;  %s599_s12 = smov %s523_s13 }
  0xf8   : > { %p10_p5 = scmp.ge.s32.totalorder %s13_s14, 4   ;;  %s600_s13 = smov %s602_s15 }
  0xfa   :  { %12 = sbr.rel (!%p10_p5) target bundleno = 2 (0x2), region = 68 }

</bundles_post_ra>
